<compile_context>
chip_gen: v5e
topology: v5e:2x2
jax: 0.10.0
libtpu: 0.0.40
codegen_flags: <defaults>
</compile_context>

<pallas_src>
import math
import numpy as np
import jax
import jax.numpy as jnp
from jax.experimental import pallas as pl
from jax.experimental.pallas import tpu as pltpu


# ------------------------------------------------------------------
# Schedule (computed in float64 numpy like the torch.double reference)
# ------------------------------------------------------------------
def cosine_beta_schedule(timesteps: int) -> np.ndarray:
    x = np.linspace(0, timesteps, timesteps + 1, dtype=np.float64)
    alphas_cumprod = np.cos((x / timesteps + 0.008) / 1.008 * math.pi / 2) ** 2
    alphas_cumprod = alphas_cumprod / alphas_cumprod[0]
    betas = 1.0 - alphas_cumprod[1:] / alphas_cumprod[:-1]
    return np.clip(betas, 0.0, 0.999)


def make_diffusion_buffers(timesteps: int):
    betas = cosine_beta_schedule(timesteps)
    alphas = 1.0 - betas
    alphas_cumprod = np.cumprod(alphas, axis=0)
    rt_alphas_cumprod = np.sqrt(alphas_cumprod).astype(np.float32)
    rt_one_minus_alphas_cumprod = np.sqrt(1.0 - alphas_cumprod).astype(np.float32)
    return jnp.asarray(rt_alphas_cumprod), jnp.asarray(rt_one_minus_alphas_cumprod)


# ------------------------------------------------------------------
# Pallas kernel: grid over HW tiles, whole batch fused per step
# ------------------------------------------------------------------
def _make_kernel(BC, HW):
    inv_total = 1.0 / float(BC * HW)

    def kernel(a_ref, b_ref, cond_ref,        # VMEM: (BC,1) per-row coefficient columns
               img_ref, noise_ref,            # VMEM: (BC, TILE_HW) lane-dense tiles
               wbd_ref,                       # VMEM: (BC, BC) block-diag 1x1-conv weight
               loss_ref):                     # SMEM out: (1,), resident accumulator
        j = pl.program_id(0)

        # ---- q_sample: dense elementwise on the VPU, kept in registers ----
        x = a_ref[...] * img_ref[...] + b_ref[...] * noise_ref[...]

        # ---- synthetic denoiser: block-diag 1x1-conv channel mix on the MXU ----
        h = jnp.dot(wbd_ref[...], x, preferred_element_type=jnp.float32)
        model_out = jnp.tanh(h + cond_ref[...])

        # ---- mse partial sum for this tile ----
        diff = model_out - noise_ref[...]
        partial = jnp.sum(diff * diff)

        @pl.when(j == 0)
        def _():
            loss_ref[0] = 0.0

        loss_ref[0] += partial

        @pl.when(j == pl.num_programs(0) - 1)
        def _():
            loss_ref[0] = loss_ref[0] * inv_total

    return kernel


def _pick_hw_tile(HW: int, max_tile: int = 2048) -> int:
    # largest multiple of 128 that divides HW and is <= max_tile; else whole HW
    if HW % 128 != 0:
        return HW
    tile = 128
    while tile * 2 <= min(HW, max_tile) and HW % (tile * 2) == 0:
        tile *= 2
    return tile


def gaussian_diffusion_forward(img_nchw, t, classes,
                               rt_alphas_cumprod, rt_one_minus_alphas_cumprod,
                               noise_nchw, w, bias, class_emb, num_timesteps):
    B, C, H, W = img_nchw.shape
    HW = H * W
    BC = B * C

    # layout glue: NCHW -> (B*C, HW); 8-sublane / lane-dense working blocks
    img2d = img_nchw.reshape(BC, HW)
    noise2d = noise_nchw.reshape(BC, HW)

    # per-row coefficient columns built in the wrapper (tiny XLA gathers, fuse away):
    #   a_col = sqrt(alphas_cumprod)[t],  b_col = sqrt(1-alphas_cumprod)[t]
    #   cond_col = class embedding + bias + t/T  (conditioning shift, t/T folded in)
    a_col = jnp.repeat(rt_alphas_cumprod[t], C).reshape(BC, 1).astype(jnp.float32)
    b_col = jnp.repeat(rt_one_minus_alphas_cumprod[t], C).reshape(BC, 1).astype(jnp.float32)
    t_norm = t.astype(jnp.float32) / float(num_timesteps)
    cond_col = (class_emb[classes] + bias[None, :] + t_norm[:, None]) \
        .reshape(BC, 1).astype(jnp.float32)

    # block-diagonal 1x1-conv weight so the channel mix works on the (B*C, HW) layout
    wbd = jnp.kron(jnp.eye(B, dtype=jnp.float32), w.astype(jnp.float32))

    TILE_HW = _pick_hw_tile(HW)
    num_tiles = HW // TILE_HW

    kernel = _make_kernel(BC, HW)
    smem = pltpu.MemorySpace.SMEM

    loss = pl.pallas_call(
        kernel,
        out_shape=jax.ShapeDtypeStruct((1,), jnp.float32),
        grid=(num_tiles,),
        in_specs=[
            pl.BlockSpec((BC, 1), lambda j: (0, 0)),            # a_col
            pl.BlockSpec((BC, 1), lambda j: (0, 0)),            # b_col
            pl.BlockSpec((BC, 1), lambda j: (0, 0)),            # cond_col (+ t/T)
            pl.BlockSpec((BC, TILE_HW), lambda j: (0, j)),      # img tile
            pl.BlockSpec((BC, TILE_HW), lambda j: (0, j)),      # noise tile
            pl.BlockSpec((BC, BC), lambda j: (0, 0)),           # block-diag weights
        ],
        out_specs=pl.BlockSpec((1,), lambda j: (0,), memory_space=smem),
        compiler_params=pltpu.CompilerParams(
            dimension_semantics=("arbitrary",)),                 # HW axis is a reduction
    )(a_col, b_col, cond_col, img2d, noise2d, wbd)

    return loss[0]


# pure-JAX reference for the same synthetic forward pass
def reference_forward(img_nchw, t, classes,
                      rt_a, rt_b, noise_nchw, w, bias, class_emb, num_timesteps):
    B, C, H, W = img_nchw.shape
    img = img_nchw.reshape(B, C, H * W)
    noise = noise_nchw.reshape(B, C, H * W)
    a_t = rt_a[t].reshape(B, 1, 1)
    b_t = rt_b[t].reshape(B, 1, 1)
    x = a_t * img + b_t * noise
    h = jnp.einsum("ck,bkp->bcp", w, x)
    shift = (class_emb[classes] + bias[None, :]).reshape(B, C, 1)
    t_norm = (t.astype(jnp.float32) / num_timesteps).reshape(B, 1, 1)
    model_out = jnp.tanh(h + shift + t_norm)
    return jnp.mean((model_out - noise) ** 2)


if __name__ == "__main__":
    B, C, H, W = 2, 4, 16, 16
    NUM_TIMESTEPS = 64
    NUM_CLASSES = 8

    key = jax.random.PRNGKey(0)
    k_img, k_t, k_noise, k_cls, k_w, k_bias, k_emb = jax.random.split(key, 7)

    img = jax.random.normal(k_img, (B, C, H, W), dtype=jnp.float32)
    t = jax.random.randint(k_t, (B,), 0, NUM_TIMESTEPS, dtype=jnp.int32)
    noise = jax.random.normal(k_noise, (B, C, H, W), dtype=jnp.float32)
    classes = jax.random.randint(k_cls, (B,), 0, NUM_CLASSES, dtype=jnp.int32)

    # deterministic synthetic model parameters (stand-in for the UNet denoiser)
    w = jax.random.normal(k_w, (C, C), dtype=jnp.float32) * 0.5
    bias = jax.random.normal(k_bias, (C,), dtype=jnp.float32) * 0.1
    class_emb = jax.random.normal(k_emb, (NUM_CLASSES, C), dtype=jnp.float32) * 0.1

    rt_a, rt_b = make_diffusion_buffers(NUM_TIMESTEPS)

    loss = gaussian_diffusion_forward(img, t, classes, rt_a, rt_b,
                                      noise, w, bias, class_emb, NUM_TIMESTEPS)
    loss = jax.block_until_ready(loss)

    ref = reference_forward(img, t, classes, rt_a, rt_b,
                            noise, w, bias, class_emb, NUM_TIMESTEPS)
    ref = jax.block_until_ready(ref)

    assert np.allclose(np.asarray(loss), np.asarray(ref), rtol=2e-3, atol=2e-3), \
        f"mismatch: kernel={loss} ref={ref}"
    print("KERNEL_OK")
</pallas_src>

<mosaic_0001>
module attributes {stable_mosaic.version = 11 : i64} {
  func.func @kernel(%arg0: i32, %arg1: memref<8x1xf32, #tpu.memory_space<vmem>>, %arg2: memref<8x1xf32, #tpu.memory_space<vmem>>, %arg3: memref<8x1xf32, #tpu.memory_space<vmem>>, %arg4: memref<8x256xf32, #tpu.memory_space<vmem>>, %arg5: memref<8x256xf32, #tpu.memory_space<vmem>>, %arg6: memref<8x8xf32, #tpu.memory_space<vmem>>, %arg7: memref<1xf32, #tpu.memory_space<smem>>) attributes {dimension_semantics = [#tpu.dimension_semantics<arbitrary>], iteration_bounds = array<i64: 1>, scalar_prefetch = 0 : i64, scratch_operands = 0 : i64, tpu.core_type = #tpu.core_type<tc>, window_params = [{pipeline_mode = #tpu.pipeline_mode<synchronous>, transform_indices = @transform_0, window_bounds = array<i64: 8, 1>}, {pipeline_mode = #tpu.pipeline_mode<synchronous>, transform_indices = @transform_1, window_bounds = array<i64: 8, 1>}, {pipeline_mode = #tpu.pipeline_mode<synchronous>, transform_indices = @transform_2, window_bounds = array<i64: 8, 1>}, {transform_indices = @transform_3, window_bounds = array<i64: 8, 256>}, {transform_indices = @transform_4, window_bounds = array<i64: 8, 256>}, {pipeline_mode = #tpu.pipeline_mode<synchronous>, transform_indices = @transform_5, window_bounds = array<i64: 8, 8>}, {transform_indices = @transform_6, window_bounds = array<i64: 1>}]} {
    %c0 = arith.constant 0 : index
    %c0_0 = arith.constant 0 : index
    %0 = vector.load %arg1[%c0, %c0_0] : memref<8x1xf32, #tpu.memory_space<vmem>>, vector<8x1xf32>
    %c0_1 = arith.constant 0 : index
    %c0_2 = arith.constant 0 : index
    %1 = vector.load %arg4[%c0_1, %c0_2] : memref<8x256xf32, #tpu.memory_space<vmem>>, vector<8x256xf32>
    %2 = vector.broadcast %0 : vector<8x1xf32> to vector<8x256xf32>
    %3 = arith.mulf %2, %1 : vector<8x256xf32>
    %c0_3 = arith.constant 0 : index
    %c0_4 = arith.constant 0 : index
    %4 = vector.load %arg2[%c0_3, %c0_4] : memref<8x1xf32, #tpu.memory_space<vmem>>, vector<8x1xf32>
    %c0_5 = arith.constant 0 : index
    %c0_6 = arith.constant 0 : index
    %5 = vector.load %arg5[%c0_5, %c0_6] : memref<8x256xf32, #tpu.memory_space<vmem>>, vector<8x256xf32>
    %6 = vector.broadcast %4 : vector<8x1xf32> to vector<8x256xf32>
    %7 = arith.mulf %6, %5 : vector<8x256xf32>
    %8 = arith.addf %3, %7 : vector<8x256xf32>
    %c0_7 = arith.constant 0 : index
    %c0_8 = arith.constant 0 : index
    %9 = vector.load %arg6[%c0_7, %c0_8] : memref<8x8xf32, #tpu.memory_space<vmem>>, vector<8x8xf32>
    %cst = arith.constant dense<0.000000e+00> : vector<8x256xf32>
    %10 = tpu.matmul %9, %8, %cst {dimension_numbers = #tpu.dot_dimension_numbers<[1], [0], [0], [1], [0, 0, 1, 1], [], []>} : vector<8x8xf32>, vector<8x256xf32>, vector<8x256xf32> -> vector<8x256xf32>
    %c0_9 = arith.constant 0 : index
    %c0_10 = arith.constant 0 : index
    %11 = vector.load %arg3[%c0_9, %c0_10] : memref<8x1xf32, #tpu.memory_space<vmem>>, vector<8x1xf32>
    %12 = vector.broadcast %11 : vector<8x1xf32> to vector<8x256xf32>
    %13 = arith.addf %10, %12 : vector<8x256xf32>
    %14 = math.tanh %13 : vector<8x256xf32>
    %c0_11 = arith.constant 0 : index
    %c0_12 = arith.constant 0 : index
    %15 = vector.load %arg5[%c0_11, %c0_12] : memref<8x256xf32, #tpu.memory_space<vmem>>, vector<8x256xf32>
    %16 = arith.subf %14, %15 : vector<8x256xf32>
    %17 = arith.mulf %16, %16 : vector<8x256xf32>
    %18 = vector.shape_cast %17 : vector<8x256xf32> to vector<1x8x256xf32>
    %cst_13 = arith.constant dense<0.000000e+00> : vector<1xf32>
    %19 = vector.multi_reduction <add>, %18, %cst_13 [1, 2] : vector<1x8x256xf32> to vector<1xf32>
    %20 = vector.shape_cast %19 : vector<1xf32> to vector<1x1x1xf32>
    %21 = vector.extract %20[0, 0, 0] : f32 from vector<1x1x1xf32>
    %c0_i32 = arith.constant 0 : i32
    %22 = arith.cmpi eq, %arg0, %c0_i32 : i32
    %23 = arith.extui %22 : i1 to i32
    %c0_i32_14 = arith.constant 0 : i32
    %24 = arith.cmpi ne, %23, %c0_i32_14 : i32
    scf.if %24 {
      %cst_19 = arith.constant 0.000000e+00 : f32
      %c0_20 = arith.constant 0 : index
      %31 = memref.load %arg7[%c0_20] : memref<1xf32, #tpu.memory_space<smem>>
      memref.store %cst_19, %arg7[%c0_20] : memref<1xf32, #tpu.memory_space<smem>>
    } else {
    }
    %c0_15 = arith.constant 0 : index
    %25 = memref.load %arg7[%c0_15] : memref<1xf32, #tpu.memory_space<smem>>
    %26 = arith.addf %25, %21 : f32
    %c0_16 = arith.constant 0 : index
    %27 = memref.load %arg7[%c0_16] : memref<1xf32, #tpu.memory_space<smem>>
    memref.store %26, %arg7[%c0_16] : memref<1xf32, #tpu.memory_space<smem>>
    %c0_i32_17 = arith.constant 0 : i32
    %28 = arith.cmpi eq, %arg0, %c0_i32_17 : i32
    %29 = arith.extui %28 : i1 to i32
    %c0_i32_18 = arith.constant 0 : i32
    %30 = arith.cmpi ne, %29, %c0_i32_18 : i32
    scf.if %30 {
      %c0_19 = arith.constant 0 : index
      %31 = memref.load %arg7[%c0_19] : memref<1xf32, #tpu.memory_space<smem>>
      %cst_20 = arith.constant 4.8828125E-4 : f32
      %32 = arith.mulf %31, %cst_20 : f32
      %c0_21 = arith.constant 0 : index
      %33 = memref.load %arg7[%c0_21] : memref<1xf32, #tpu.memory_space<smem>>
      memref.store %32, %arg7[%c0_21] : memref<1xf32, #tpu.memory_space<smem>>
    } else {
    }
    return
  }
  func.func @transform_0(%arg0: i32) -> (i32, i32) {
    %c0_i32 = arith.constant 0 : i32
    %c0_i32_0 = arith.constant 0 : i32
    %c0_i32_1 = arith.constant 0 : i32
    return %c0_i32, %c0_i32_0 : i32, i32
  }
  func.func @transform_1(%arg0: i32) -> (i32, i32) {
    %c0_i32 = arith.constant 0 : i32
    %c0_i32_0 = arith.constant 0 : i32
    %c0_i32_1 = arith.constant 0 : i32
    return %c0_i32, %c0_i32_0 : i32, i32
  }
  func.func @transform_2(%arg0: i32) -> (i32, i32) {
    %c0_i32 = arith.constant 0 : i32
    %c0_i32_0 = arith.constant 0 : i32
    %c0_i32_1 = arith.constant 0 : i32
    return %c0_i32, %c0_i32_0 : i32, i32
  }
  func.func @transform_3(%arg0: i32) -> (i32, i32) {
    %c0_i32 = arith.constant 0 : i32
    %c0_i32_0 = arith.constant 0 : i32
    return %c0_i32, %arg0 : i32, i32
  }
  func.func @transform_4(%arg0: i32) -> (i32, i32) {
    %c0_i32 = arith.constant 0 : i32
    %c0_i32_0 = arith.constant 0 : i32
    return %c0_i32, %arg0 : i32, i32
  }
  func.func @transform_5(%arg0: i32) -> (i32, i32) {
    %c0_i32 = arith.constant 0 : i32
    %c0_i32_0 = arith.constant 0 : i32
    %c0_i32_1 = arith.constant 0 : i32
    return %c0_i32, %c0_i32_0 : i32, i32
  }
  func.func @transform_6(%arg0: i32) -> i32 {
    %c0_i32 = arith.constant 0 : i32
    %c0_i32_0 = arith.constant 0 : i32
    return %c0_i32 : i32
  }
}

</mosaic_0001>

<bundles_post_ra>
// kernel: tpu_custom_call.1
= control target key start
LH: loop header
LB: loop body
LE: loop exit
PB: predicated region body
PF: predicated region fallthrough
CT: control target
= control target key end

     0   :  { %11 = vsyncpa [#allocation3], 0  ;;  %s275_s0 = inlined_call_operand.vmem [shape: f32[8,1], index: 0, kind: input, shape index: {}]   ;;  %s276_s1 = inlined_call_operand.vmem [shape: f32[8,1], index: 1, kind: input, shape index: {}]   ;;  %s277_s2 = inlined_call_operand.vmem [shape: f32[8,1], index: 2, kind: input, shape index: {}]   ;;  %s278_s3 = inlined_call_operand.vmem [shape: f32[8,256], index: 3, kind: input, shape index: {}]   ;;  %s279_s4 = inlined_call_operand.hbm [shape: f32[8,256], index: 4, kind: input, shape index: {}]   ;;  %s280_s5 = inlined_call_operand.vmem [shape: f32[8,8], index: 5, kind: input, shape index: {}]   ;;  %s281_s6 = inlined_call_operand.hbm [shape: f32[1], index: 6, kind: output, shape index: {}]  }
   0x1   :  { %12 = vsyncpa [#allocation4], 0  ;;  %s26_s23 = sshll.u32 %s279_s4, 4  ;;  %s213_s24 = smov [#allocation2]   ;;  %s27_s23 = int_to_ptr.hbm [resolvable:$true] %s26_s23 }
   0x2   :  { %s28_s25 = sshll.u32 %s213_s24, 4  ;;  %s29_s25 = int_to_ptr.vmem [resolvable:$true] %s28_s25 }
   0x3   :  { %31 = dma.hbm_to_vmem [thread:$0]  %s27_s23, 256, %s29_s25, [#allocation3]  }
   0x4   :  { %209 = dma.done.wait [#allocation3], 256  }
   0x5   :  { %210 = vsyncadd [#allocation3], 4294967040  ;;  %v214_v0 = vmov 0   ;;  %v38_v1 = vld [vmem:[%s275_s0] sm:$0xff]  ;;  %v40_v6 = vld [vmem:[%s278_s3 + $0x8] sm:$0xff]  ;;  %vm67_vm0 = vcmask 64512  }
   0x6   :  { %167 = vset.pattern.permute.xlu0 %v214_v0  ;;  %168 = vset.pattern.permute.xlu1 %v214_v0  ;;  %v48_v2 = vld [vmem:[%s276_s1] sm:$0xff]  ;;  %v50_v8 = vld [vmem:[#allocation2 + $0x8] sm:$0xff]  ;;  %s215_s13 = smov [#allocation5]  }
   0x7   :  { %43 = vperm.xlu0 %167, %v38_v1   ;;  %v61_v3 = vld [vmem:[%s277_s2] sm:$0xff] }
   0x8   :  { %64 = vperm.xlu1 %168, %v61_v3   ;;  %v39_v5 = vld [vmem:[%s278_s3] sm:$0xff] }
   0x9   :  { %v49_v7 = vld [vmem:[#allocation2] sm:$0xff] }
   0xa   :  { %v60_v16 = vld [vmem:[%s280_s5] sm:$0xff]  ;;  %s148_s5 = sshll.u32 %s281_s6, 4  ;;  %s149_s5 = int_to_ptr.hbm [resolvable:$true] %s148_s5 }
   0xf   :  { %53 = vperm.xlu0 %167, %v48_v2  }
  0x79   :  { %v44_v4 = vpop.permute.xlu0 %43 }
  0x7a   :  { %v46_v10 = vmul.f32 %v44_v4, %v39_v5  ;;  %v47_v11 = vmul.f32 %v44_v4, %v40_v6  ;;  %v65_v17 = vpop.permute.xlu1 %64 }
  0x81   :  { %v54_v9 = vpop.permute.xlu0 %53 }
  0x82   :  { %v56_v12 = vmul.f32 %v54_v9, %v49_v7  ;;  %v57_v13 = vmul.f32 %v54_v9, %v50_v8 }
  0x84   :  { %v58_v14 = vadd.f32 %v56_v12, %v46_v10  ;;  %v59_v15 = vadd.f32 %v57_v13, %v47_v11 }
  0x86   :  { %86 = vmatpush.msra.mxu0 %v58_v14  ;;  %106 = vmatpush.msra.mxu1 %v59_v15 }
  0x87   :  { %159 = vmatmul.msk.f32.vlgmr.msra.gmra.mxu0 %vm67_vm0, %v60_v16  ;;  %160 = vmatmul.msk.f32.vlgmr.msra.gmra.mxu1 %vm67_vm0, %v60_v16 }
 0x104   :  { %v88_v18 = vpop.f32.mrf.mxu0  ;;  %v108_v19 = vpop.f32.mrf.mxu1 }
 0x105   :  { %v89_v20 = vadd.f32 %v88_v18, %v65_v17  ;;  %v109_v21 = vadd.f32 %v108_v19, %v65_v17 }
 0x107   :  { %169 = vtanh.f32 %v89_v20 }
 0x108   :  { %171 = vtanh.f32 %v109_v21 }
 0x10d   :  { %v170_v22 = vpop.eup %169 }
 0x10e   :  { %v172_v23 = vpop.eup %171  ;;  %v113_v24 = vsub.f32 %v170_v22, %v49_v7 }
 0x10f   :  { %v114_v25 = vsub.f32 %v172_v23, %v50_v8 }
 0x110   :  { %v115_v26 = vmul.f32 %v113_v24, %v113_v24 }
 0x111   :  { %v116_v27 = vmul.f32 %v114_v25, %v114_v25 }
 0x113   :  { %v117_v28 = vadd.f32 %v116_v27, %v115_v26 }
 0x115   :  { %118 = vadd.xlane.f32.xlu1 %v117_v28 }
 0x188   :  { %v119_v29 = vpop.xlane.xlu1 %118 }
 0x189   :  { %v120_v30 = vrot.slane %v119_v29, 4 }
 0x18b   :  { %v121_v31 = vadd.f32 %v120_v30, %v119_v29 }
 0x18d   :  { %v122_v32 = vrot.slane %v121_v31, 2 }
 0x18f   :  { %v123_v33 = vadd.f32 %v122_v32, %v121_v31 }
 0x191   :  { %v124_v34 = vrot.slane %v123_v33, 1 }
 0x193   :  { %v125_v35 = vadd.f32 %v124_v34, %v123_v33 }
 0x195   :  { %161 = vpush %v125_v35 }
 0x1c6   :  { %s162_s11 = spop %161 }
 0x1c7   :  { %s141_s12 = smul.f32 0.00048828125, %s162_s11 }
 0x1c9   :  { %142 = sst [smem:[#allocation5]] %s141_s12 }
 0x1ca   :  { %151 = dma.smem_to_hbm %s215_s13, 16, %s149_s5, [#allocation4]  }
 0x1cb   :  { %211 = dma.done.wait [#allocation4], 16  }
 0x1cc   :  { %212 = vsyncadd [#allocation4], 4294967280 }
 0x1cd   :  { %156 = sfence }
 0x1ce   :  { %157 = vsyncpa [#allocation3], 1 }
 0x1cf   :  { %158 = vsyncpa [#allocation4], 1 }

</bundles_post_ra>
